<compile_context>
chip_gen: v6e
topology: v6e:2x2x1
jax: 0.10.0
libtpu: 0.0.40
codegen_flags: <defaults>
</compile_context>

<pallas_src>
import jax
import jax.numpy as jnp
from jax.experimental import pallas as pl
from jax.experimental.pallas import tpu as pltpu

# Conservative per-kernel VMEM budget: well under v7x's 32 MiB default scoped
# limit (64 MiB physical), and trivially fine on v5e/v6e (128 MiB physical).
_VMEM_BUDGET_BYTES = 24 * 1024 * 1024


def _copy_kernel(x_ref, o_ref):
    # Pure DMA-bound copy of the current block.
    o_ref[...] = x_ref[...]


def identity(x: jax.Array) -> jax.Array:
    """Pallas implementation of forward(x) = x (exact shape/dtype preserved).

    Performs one HBM read + one HBM write of x.  If the caller can donate x
    (jit(..., donate_argnums=...)) and no custom-call boundary is required,
    returning x directly is strictly cheaper.
    """
    if x.size == 0:
        # Nothing to do for empty tensors (avoids a degenerate pallas_call).
        return x

    nbytes = x.size * x.dtype.itemsize
    out_shape = jax.ShapeDtypeStruct(x.shape, x.dtype)
    # Advisory hint: this custom call is a pure mem-bound copy, not an opaque
    # expensive op — lets XLA schedule/overlap surrounding HLO around it.
    cost = pl.CostEstimate(flops=0, transcendentals=0,
                           bytes_accessed=int(2 * nbytes))

    # Fast path: whole array as a single block (input + output buffers both
    # comfortably inside the VMEM budget on v5e / v6e / v7x).  No grid, no
    # per-step pipeline overhead, no (8,128) constraints (full-extent block).
    if x.ndim < 2 or 2 * nbytes <= _VMEM_BUDGET_BYTES:
        return pl.pallas_call(
            _copy_kernel,
            out_shape=out_shape,
            cost_estimate=cost,
        )(x)

    # Large-input fallback: tile along the leading axis only; trailing dims
    # stay at full extent so the last two block dims equal the array dims
    # (satisfies the (8,128) rule for arbitrary shapes).  Blocks are sized so
    # (in + out) x double-buffering stays under the v7x-safe VMEM budget.
    d0 = x.shape[0]
    rest = x.shape[1:]
    row_bytes = (x.size // d0) * x.dtype.itemsize
    block0 = max(1, min(d0, _VMEM_BUDGET_BYTES // (4 * row_bytes)))
    block_shape = (block0,) + rest
    idx_map = lambda i: (i,) + (0,) * len(rest)

    return pl.pallas_call(
        _copy_kernel,
        out_shape=out_shape,
        grid=(pl.cdiv(d0, block0),),
        in_specs=[pl.BlockSpec(block_shape, idx_map)],
        out_specs=pl.BlockSpec(block_shape, idx_map),
        cost_estimate=cost,
        compiler_params=pltpu.CompilerParams(
            # Purely mem-bound copy: splitting the leading axis lets v7x's two
            # TensorCores each drive half the DMA traffic; harmless on v5e/v6e.
            dimension_semantics=("parallel",),
        ),
    )(x)


if __name__ == "__main__":
    key = jax.random.PRNGKey(0)
    x = jax.random.normal(key, (2, 4, 16, 16), dtype=jnp.float32)  # NCHW

    y = identity(x)
    jax.block_until_ready(y)

    assert y.shape == x.shape and y.dtype == x.dtype
    assert bool(jnp.all(y == x))

    # Empty-tensor edge case.
    e = jnp.zeros((0, 4, 16, 16), dtype=jnp.float32)
    ye = identity(e)
    jax.block_until_ready(ye)
    assert ye.shape == e.shape and ye.dtype == e.dtype

    print("KERNEL_OK")
</pallas_src>

<mosaic_0001>
module attributes {stable_mosaic.version = 11 : i64} {
  func.func @_copy_kernel(%arg0: memref<2x4x16x16xf32, #tpu.memory_space<vmem>>, %arg1: memref<2x4x16x16xf32, #tpu.memory_space<vmem>>) attributes {dimension_semantics = [], scalar_prefetch = 0 : i64, scratch_operands = 0 : i64, tpu.core_type = #tpu.core_type<tc>} {
    %c0 = arith.constant 0 : index
    %c0_0 = arith.constant 0 : index
    %c0_1 = arith.constant 0 : index
    %c0_2 = arith.constant 0 : index
    %0 = vector.load %arg0[%c0, %c0_0, %c0_1, %c0_2] : memref<2x4x16x16xf32, #tpu.memory_space<vmem>>, vector<2x4x16x16xf32>
    %c0_3 = arith.constant 0 : index
    %c0_4 = arith.constant 0 : index
    %c0_5 = arith.constant 0 : index
    %c0_6 = arith.constant 0 : index
    %1 = vector.load %arg1[%c0_3, %c0_4, %c0_5, %c0_6] : memref<2x4x16x16xf32, #tpu.memory_space<vmem>>, vector<2x4x16x16xf32>
    tpu.vector_store %arg1[%c0_3, %c0_4, %c0_5, %c0_6], %0 {strides = array<i32>} : memref<2x4x16x16xf32, #tpu.memory_space<vmem>>, vector<2x4x16x16xf32>,
    return
  }
}

</mosaic_0001>

<bundles_post_ra>
// kernel: tpu_custom_call.1
= control target key start
LH: loop header
LB: loop body
LE: loop exit
PB: predicated region body
PF: predicated region fallthrough
CT: control target
= control target key end

     0   :  { %6 = vsyncpa [#allocation3], 0  ;;  %s163_s0 = inlined_call_operand.hbm [shape: f32[2,4,16,16], index: 0, kind: input, shape index: {}]   ;;  %s164_s1 = inlined_call_operand.hbm [shape: f32[2,4,16,16], index: 1, kind: output, shape index: {}]  }
   0x1   :  { %7 = vsyncpa [#allocation4], 0  ;;  %s121_s6 = smov [#allocation2]  }
   0x2   :  { %s13_s7 = sshll.u32 %s121_s6, 4  ;;  %s14_s7 = int_to_ptr.vmem [resolvable:$true] %s13_s7 }
   0x3   :  { %s85_s8 = scalar_lea.vmem %s14_s7, 2048  ;;  %p90_p1 = scmp.lt.s32.totalorder %s14_s7, %s14_s7 }
   0x4   :  { %p86_p0 = scmp.ne.s32.totalorder %s14_s7, %s85_s8  ;;  %p91_p2 = scmp.lt.s32.totalorder %s85_s8, %s85_s8 }
   0x6   :  { %p92_p3 = por %p91_p2, %p90_p1 }
   0x8   :  { %p93_p4 = pnand %p92_p3, %p86_p0 }
   0xa   :  { %96 = shalt.err (!%p93_p4)
}
   0xb   :  { %s122_s9 = smov 128   ;;  %s123_s10 = smov 8  }
   0xc   :  { %19 = dma.hbm_to_vmem [thread:$0]  %s163_s0, 2048, %s14_s7, [#allocation3], %s122_s9, %s122_s9, %s123_s10  }
   0xd   :  { %117 = dma.done.wait [#allocation3], 2048  }
   0xe   :  { %118 = vsyncadd [#allocation3], 4294965248  ;;  %vm39_vm0 = vcmask 130048   ;;  %v23_v0 = vld [vmem:[#allocation2] sm:$0xff]  ;;  %v24_v1 = vld [vmem:[#allocation2 + $0x8] sm:$0xff]  ;;  %s124_s13 = smov [#allocation5]  }
   0xf   :  { %v25_v2 = vld [vmem:[#allocation2 + $0x10] sm:$0xff]  ;;  %40 = vst.msk [vmem:[#allocation5] sm:$0xff] %vm39_vm0, %v23_v0  ;;  %41 = vst.msk [vmem:[#allocation5 + $0x8] sm:$0xff] %vm39_vm0, %v24_v1  ;;  %v26_v3 = vld [vmem:[#allocation2 + $0x18] sm:$0xff]  ;;  %s61_s14 = sshll.u32 %s124_s13, 4  ;;  %s62_s14 = int_to_ptr.vmem [resolvable:$true] %s61_s14 }
  0x10   :  { %42 = vst.msk [vmem:[#allocation5 + $0x10] sm:$0xff] %vm39_vm0, %v25_v2  ;;  %v27_v4 = vld [vmem:[#allocation2 + $0x20] sm:$0xff]  ;;  %v28_v5 = vld [vmem:[#allocation2 + $0x28] sm:$0xff]  ;;  %43 = vst.msk [vmem:[#allocation5 + $0x18] sm:$0xff] %vm39_vm0, %v26_v3  ;;  %s97_s0 = scalar_lea.vmem %s62_s14, 2048  ;;  %p102_p6 = scmp.lt.s32.totalorder %s62_s14, %s62_s14 }
  0x11   :  { %44 = vst.msk [vmem:[#allocation5 + $0x20] sm:$0xff] %vm39_vm0, %v27_v4  ;;  %45 = vst.msk [vmem:[#allocation5 + $0x28] sm:$0xff] %vm39_vm0, %v28_v5  ;;  %v29_v6 = vld [vmem:[#allocation2 + $0x30] sm:$0xff]  ;;  %v30_v7 = vld [vmem:[#allocation2 + $0x38] sm:$0xff]  ;;  %p98_p5 = scmp.ne.s32.totalorder %s62_s14, %s97_s0  ;;  %p103_p7 = scmp.lt.s32.totalorder %s97_s0, %s97_s0 }
  0x12   :  { %v31_v8 = vld [vmem:[#allocation2 + $0x40] sm:$0xff]  ;;  %46 = vst.msk [vmem:[#allocation5 + $0x30] sm:$0xff] %vm39_vm0, %v29_v6  ;;  %47 = vst.msk [vmem:[#allocation5 + $0x38] sm:$0xff] %vm39_vm0, %v30_v7  ;;  %v32_v9 = vld [vmem:[#allocation2 + $0x48] sm:$0xff] }
  0x13   :  { %48 = vst.msk [vmem:[#allocation5 + $0x40] sm:$0xff] %vm39_vm0, %v31_v8  ;;  %v33_v10 = vld [vmem:[#allocation2 + $0x50] sm:$0xff]  ;;  %v34_v11 = vld [vmem:[#allocation2 + $0x58] sm:$0xff]  ;;  %49 = vst.msk [vmem:[#allocation5 + $0x48] sm:$0xff] %vm39_vm0, %v32_v9  ;;  %p104_p8 = por %p103_p7, %p102_p6 }
  0x14   :  { %50 = vst.msk [vmem:[#allocation5 + $0x50] sm:$0xff] %vm39_vm0, %v33_v10  ;;  %51 = vst.msk [vmem:[#allocation5 + $0x58] sm:$0xff] %vm39_vm0, %v34_v11  ;;  %v35_v12 = vld [vmem:[#allocation2 + $0x60] sm:$0xff]  ;;  %v36_v13 = vld [vmem:[#allocation2 + $0x68] sm:$0xff] }
  0x15   :  { %v37_v14 = vld [vmem:[#allocation2 + $0x70] sm:$0xff]  ;;  %52 = vst.msk [vmem:[#allocation5 + $0x60] sm:$0xff] %vm39_vm0, %v35_v12  ;;  %53 = vst.msk [vmem:[#allocation5 + $0x68] sm:$0xff] %vm39_vm0, %v36_v13  ;;  %v38_v15 = vld [vmem:[#allocation2 + $0x78] sm:$0xff]  ;;  %p105_p9 = pnand %p104_p8, %p98_p5 }
  0x16   :  { %54 = vst.msk [vmem:[#allocation5 + $0x70] sm:$0xff] %vm39_vm0, %v37_v14  ;;  %55 = vst.msk [vmem:[#allocation5 + $0x78] sm:$0xff] %vm39_vm0, %v38_v15 }
  0x17   :  { %108 = shalt.err (!%p105_p9)
}
  0x18   :  { %67 = dma.vmem_to_hbm [thread:$0]  %s62_s14, 2048, %s164_s1, [#allocation4], %s122_s9, %s122_s9, %s123_s10  }
  0x19   :  { %119 = dma.done.wait [#allocation4], 2048  }
  0x1a   :  { %120 = vsyncadd [#allocation4], 4294965248 }
  0x1b   :  { %71 = vsyncpa [#allocation3], 1 }
  0x1c   :  { %72 = vsyncpa [#allocation4], 1 }

</bundles_post_ra>
